<compile_context>
chip_gen: v7x
topology: tpu7x:2x2x1
jax: 0.10.0
libtpu: 0.0.40
codegen_flags: <defaults>
</compile_context>

<pallas_src>
import functools

import jax
import jax.numpy as jnp
from jax.experimental import pallas as pl
from jax.experimental.pallas import tpu as pltpu


def _round_up(x, m):
    return (x + m - 1) // m * m


def _mlp_en_kernel(x_ref, w_ref, o_ref, *, in_dims, hidden, out_dim):
    # Packed weight layout (rows of w_ref):
    #   [0, in)              W1^T (in, hidden)
    #   [in, in+1)           b1   (1, hidden)
    #   [in+1, in+1+h)       W2^T (hidden, hidden)
    #   [in+1+h, in+2+h)     b2   (1, hidden)
    #   [in+2+h, in+2+2h)    W3^T (hidden, out)
    #   [in+2+2h, in+3+2h)   b3   (1, out)
    w = w_ref[...]                                   # resident, loaded once
    r = 0
    w1 = w[r:r + in_dims, :hidden]; r += in_dims
    b1 = w[r:r + 1, :hidden];       r += 1
    w2 = w[r:r + hidden, :hidden];  r += hidden
    b2 = w[r:r + 1, :hidden];       r += 1
    w3 = w[r:r + hidden, :out_dim]; r += hidden
    b3 = w[r:r + 1, :out_dim]

    x = x_ref[...]                                   # (TILE_N, in_dims)
    h = jnp.maximum(jnp.dot(x, w1, preferred_element_type=jnp.float32) + b1, 0.0)
    h = jnp.maximum(jnp.dot(h, w2, preferred_element_type=jnp.float32) + b2, 0.0)
    o_ref[...] = jnp.dot(h, w3, preferred_element_type=jnp.float32) + b3


def init_params(key, in_dims=5, out=12):
    ks = jax.random.split(key, 6)
    s = 0.1
    return dict(
        fc1_w=s * jax.random.normal(ks[0], (12, in_dims), jnp.float32),
        fc1_b=s * jax.random.normal(ks[1], (12,), jnp.float32),
        fc2_w=s * jax.random.normal(ks[2], (12, 12), jnp.float32),
        fc2_b=s * jax.random.normal(ks[3], (12,), jnp.float32),
        fc3_w=s * jax.random.normal(ks[4], (out, 12), jnp.float32),
        fc3_b=s * jax.random.normal(ks[5], (out,), jnp.float32),
    )


def mlp_en_forward(x, params, *, tile_n=None):
    """x: (N, in_dims) float32. Returns (N, out) float32."""
    N, in_dims = x.shape
    hidden = params["fc1_w"].shape[0]
    out_dim = params["fc3_w"].shape[0]
    lanes = max(hidden, out_dim)

    # ---- host glue: pack all weights/biases into one VMEM-resident constant.
    def pad_cols(a):
        return jnp.pad(a, ((0, 0), (0, lanes - a.shape[1])))

    w_packed = jnp.concatenate([
        pad_cols(params["fc1_w"].T),            # (in_dims, lanes)
        pad_cols(params["fc1_b"][None, :]),     # (1, lanes)
        pad_cols(params["fc2_w"].T),            # (hidden, lanes)
        pad_cols(params["fc2_b"][None, :]),     # (1, lanes)
        pad_cols(params["fc3_w"].T),            # (hidden, lanes)
        pad_cols(params["fc3_b"][None, :]),     # (1, lanes)
    ], axis=0).astype(jnp.float32)
    w_rows = w_packed.shape[0]

    # ---- batch tiling: biggest-reasonable tile, multiple of 8 sublanes.
    if tile_n is None:
        tile_n = min(1024, _round_up(max(N, 1), 8))
    tile_n = _round_up(tile_n, 8)
    n_pad = _round_up(N, tile_n)
    x_p = jnp.pad(x.astype(jnp.float32), ((0, n_pad - N), (0, 0)))

    kernel = functools.partial(
        _mlp_en_kernel, in_dims=in_dims, hidden=hidden, out_dim=out_dim)

    out = pl.pallas_call(
        kernel,
        out_shape=jax.ShapeDtypeStruct((n_pad, out_dim), jnp.float32),
        grid=(n_pad // tile_n,),
        in_specs=[
            pl.BlockSpec((tile_n, in_dims), lambda i: (i, 0)),   # activations
            pl.BlockSpec((w_rows, lanes), lambda i: (0, 0)),     # resident weights
        ],
        out_specs=pl.BlockSpec((tile_n, out_dim), lambda i: (i, 0)),
        compiler_params=pltpu.CompilerParams(
            dimension_semantics=("parallel",),
            vmem_limit_bytes=32 * 1024 * 1024,
        ),
    )(x_p, w_packed)
    return out[:N]


def mlp_en_reference(x, params):
    """Pure-JAX reference mirroring the PyTorch forward (eval mode)."""
    h = jnp.maximum(x @ params["fc1_w"].T + params["fc1_b"], 0.0)
    h = jnp.maximum(h @ params["fc2_w"].T + params["fc2_b"], 0.0)
    return (h @ params["fc3_w"].T + params["fc3_b"]).astype(jnp.float32)


if __name__ == "__main__":
    key = jax.random.PRNGKey(0)
    kx, kp = jax.random.split(key)

    N, in_dims, out_dim = 64, 5, 12
    x = jax.random.normal(kx, (N, in_dims), jnp.float32)
    params = init_params(kp, in_dims=in_dims, out=out_dim)

    # tile_n=16 -> grid of 4 batch tiles: exercises the pipelined grid path
    # (and batch padding) even at this small demo size.
    y = mlp_en_forward(x, params, tile_n=16)
    y = jax.block_until_ready(y)

    ref = mlp_en_reference(x, params)
    assert y.shape == (N, out_dim) and y.dtype == jnp.float32
    assert jnp.allclose(y, ref, atol=1e-3, rtol=1e-3), (y, ref)

    print("KERNEL_OK")
</pallas_src>

<mosaic_0001>
module attributes {stable_mosaic.version = 11 : i64} {
  func.func @_mlp_en_kernel(%arg0: i32, %arg1: memref<16x5xf32, #tpu.memory_space<vmem>>, %arg2: memref<32x12xf32, #tpu.memory_space<vmem>>, %arg3: memref<16x12xf32, #tpu.memory_space<vmem>>) attributes {dimension_semantics = [#tpu.dimension_semantics<parallel>], iteration_bounds = array<i64: 4>, scalar_prefetch = 0 : i64, scratch_operands = 0 : i64, tpu.core_type = #tpu.core_type<tc>, window_params = [{transform_indices = @transform_0, window_bounds = array<i64: 16, 5>}, {pipeline_mode = #tpu.pipeline_mode<synchronous>, transform_indices = @transform_1, window_bounds = array<i64: 32, 12>}, {transform_indices = @transform_2, window_bounds = array<i64: 16, 12>}]} {
    %c0 = arith.constant 0 : index
    %c0_0 = arith.constant 0 : index
    %0 = vector.load %arg2[%c0, %c0_0] : memref<32x12xf32, #tpu.memory_space<vmem>>, vector<32x12xf32>
    %1 = vector.extract_strided_slice %0 {offsets = [0, 0], sizes = [5, 12], strides = [1, 1]} : vector<32x12xf32> to vector<5x12xf32>
    %2 = vector.extract_strided_slice %0 {offsets = [5, 0], sizes = [1, 12], strides = [1, 1]} : vector<32x12xf32> to vector<1x12xf32>
    %3 = vector.extract_strided_slice %0 {offsets = [6, 0], sizes = [12, 12], strides = [1, 1]} : vector<32x12xf32> to vector<12x12xf32>
    %4 = vector.extract_strided_slice %0 {offsets = [18, 0], sizes = [1, 12], strides = [1, 1]} : vector<32x12xf32> to vector<1x12xf32>
    %5 = vector.extract_strided_slice %0 {offsets = [19, 0], sizes = [12, 12], strides = [1, 1]} : vector<32x12xf32> to vector<12x12xf32>
    %6 = vector.extract_strided_slice %0 {offsets = [31, 0], sizes = [1, 12], strides = [1, 1]} : vector<32x12xf32> to vector<1x12xf32>
    %c0_1 = arith.constant 0 : index
    %c0_2 = arith.constant 0 : index
    %7 = vector.load %arg1[%c0_1, %c0_2] : memref<16x5xf32, #tpu.memory_space<vmem>>, vector<16x5xf32>
    %cst = arith.constant dense<0.000000e+00> : vector<16x12xf32>
    %8 = tpu.matmul %7, %1, %cst {dimension_numbers = #tpu.dot_dimension_numbers<[1], [0], [0], [1], [0, 0, 1, 1], [], []>} : vector<16x5xf32>, vector<5x12xf32>, vector<16x12xf32> -> vector<16x12xf32>
    %9 = vector.broadcast %2 : vector<1x12xf32> to vector<16x12xf32>
    %10 = arith.addf %8, %9 : vector<16x12xf32>
    %cst_3 = arith.constant 0.000000e+00 : f32
    %11 = vector.broadcast %cst_3 : f32 to vector<16x12xf32>
    %12 = arith.maximumf %10, %11 : vector<16x12xf32>
    %cst_4 = arith.constant dense<0.000000e+00> : vector<16x12xf32>
    %13 = tpu.matmul %12, %3, %cst_4 {dimension_numbers = #tpu.dot_dimension_numbers<[1], [0], [0], [1], [0, 0, 1, 1], [], []>} : vector<16x12xf32>, vector<12x12xf32>, vector<16x12xf32> -> vector<16x12xf32>
    %14 = vector.broadcast %4 : vector<1x12xf32> to vector<16x12xf32>
    %15 = arith.addf %13, %14 : vector<16x12xf32>
    %cst_5 = arith.constant 0.000000e+00 : f32
    %16 = vector.broadcast %cst_5 : f32 to vector<16x12xf32>
    %17 = arith.maximumf %15, %16 : vector<16x12xf32>
    %cst_6 = arith.constant dense<0.000000e+00> : vector<16x12xf32>
    %18 = tpu.matmul %17, %5, %cst_6 {dimension_numbers = #tpu.dot_dimension_numbers<[1], [0], [0], [1], [0, 0, 1, 1], [], []>} : vector<16x12xf32>, vector<12x12xf32>, vector<16x12xf32> -> vector<16x12xf32>
    %19 = vector.broadcast %6 : vector<1x12xf32> to vector<16x12xf32>
    %20 = arith.addf %18, %19 : vector<16x12xf32>
    %c0_7 = arith.constant 0 : index
    %c0_8 = arith.constant 0 : index
    %21 = vector.load %arg3[%c0_7, %c0_8] : memref<16x12xf32, #tpu.memory_space<vmem>>, vector<16x12xf32>
    tpu.vector_store %arg3[%c0_7, %c0_8], %20 {strides = array<i32>} : memref<16x12xf32, #tpu.memory_space<vmem>>, vector<16x12xf32>,
    return
  }
  func.func @transform_0(%arg0: i32) -> (i32, i32) {
    %c0_i32 = arith.constant 0 : i32
    %c0_i32_0 = arith.constant 0 : i32
    return %arg0, %c0_i32 : i32, i32
  }
  func.func @transform_1(%arg0: i32) -> (i32, i32) {
    %c0_i32 = arith.constant 0 : i32
    %c0_i32_0 = arith.constant 0 : i32
    %c0_i32_1 = arith.constant 0 : i32
    return %c0_i32, %c0_i32_0 : i32, i32
  }
  func.func @transform_2(%arg0: i32) -> (i32, i32) {
    %c0_i32 = arith.constant 0 : i32
    %c0_i32_0 = arith.constant 0 : i32
    return %arg0, %c0_i32 : i32, i32
  }
}

</mosaic_0001>

<bundles_post_ra>
// kernel: tpu_custom_call.1
= control target key start
LH: loop header
LB: loop body
LE: loop exit
PB: predicated region body
PF: predicated region fallthrough
CT: control target
= control target key end

     0   :  { %s590_s9 = smov 0   ;;  %s635_s0 = inlined_call_operand.vmem [shape: f32[64,5], index: 0, kind: input, shape index: {}]   ;;  %s636_s1 = inlined_call_operand.vmem [shape: f32[32,12], index: 1, kind: input, shape index: {}]   ;;  %s637_s2 = inlined_call_operand.vmem [shape: f32[64,12], index: 2, kind: output, shape index: {}]  }
   0x1 LB: > { %s495_s10 = sadd.s32 4294967295, %s572_s9   ;;  %p499_p0 = scmp.ge.s32.totalorder %s572_s9, 1  ;;  %s572_s9 = sphi %s590_s9, %s12_s9  }
   0x2   : > { %p113_p1 = scmp.lt.s32.totalorder %s572_s9, 5 }
   0x4   : > { %p114_p2 = pnand %p499_p0, %p113_p1 }
   0x5   : > { %v147_v0 = vld [vmem:[%s636_s1] sm:$0xff] (!%p114_p2)  ;;  %vm164_vm0 = vcmask (!%p114_p2), 1044480   ;;  %s500_s13 = sshll.u32 (!%p114_p2), %s495_s10, 1  ;;  %vm157_vm1 = vcmask (!%p114_p2), 39936   ;;  %v150_v3 = vld [vmem:[%s636_s1 + $0x18] sm:$0xff] (!%p114_p2)  ;;  %v149_v4 = vld [vmem:[%s636_s1 + $0x10] sm:$0xff] (!%p114_p2)  ;;  %v153_v16 = vlaneseq (!%p114_p2) }
   0x6   : > { %117 = sbr.rel (%p114_p2) target bundleno = 670 (0x29e), region = 28  ;;  %526 = vmatprep.subr.msk.mxu0 (!%p114_p2), %vm164_vm0, %v147_v0  ;;  %p136_p3 = scmp.lt.s32.totalorder (!%p114_p2), %s500_s13, 7  ;;  %v350_v5 = vrot.slane (!%p114_p2), %v149_v4, 3  ;;  %v351_v6 = vrot.slane (!%p114_p2), %v150_v3, 3  ;;  %v148_v8 = vld [vmem:[%s636_s1 + $0x8] sm:$0xff] (!%p114_p2)  ;;  %v252_v9 = vrot.slane (!%p114_p2), %v147_v0, 6 }
   0x7   : > { %527 = vmatpush3.msk.msra.mxu0 (!%p114_p2), %vm164_vm0, %v147_v0  ;;  %v253_v10 = vrot.slane (!%p114_p2), %v148_v8, 6  ;;  %v255_v11 = vrot.slane (!%p114_p2), %v149_v4, 6  ;;  %vm251_vm2 = vcmask (!%p114_p2), 1041408   ;;  %vm265_vm3 = vcmask (!%p114_p2), 1043456  }
   0x8   : > { %v352_v7 = vsel (!%p114_p2), %vm164_vm0, %v350_v5, %v351_v6  ;;  %vm574_vm4 = vmmov (!%p114_p2), 1   ;;  %v154_v17 = vshrl.u32 (!%p114_p2), %v153_v16, 7  ;;  %vm258_vm6 = vcmask (!%p114_p2), 97280  }
   0x9   : > { %v551_v12 = vpack.c.bf16 (!%p114_p2), %v351_v6, %v352_v7  ;;  %v254_v13 = vsel (!%p114_p2), %vm251_vm2, %v252_v9, %v253_v10  ;;  %v256_v14 = vsel (!%p114_p2), %vm251_vm2, %v253_v10, %v255_v11  ;;  %vm546_vm5 = vmpackc.low (!%p114_p2), %vm265_vm3, %vm574_vm4 }
   0xa   : > { %v545_v15 = vpack.c.bf16 (!%p114_p2), %v256_v14, %v254_v13  ;;  %v155_v18 = vsub.s32 (!%p114_p2), 5, %v154_v17  ;;  %v247_v26 = vsub.s32 (!%p114_p2), 2, %v154_v17  ;;  %v347_v34 = vsub.s32 (!%p114_p2), 7, %v154_v17 }
   0xb   : > { %553 = vmatprep.subr.msk.bf16.mxu0 (!%p114_p2), %vm546_vm5, %v551_v12 }
   0xc   : > { %547 = vmatprep.subr.msk.bf16.mxu1 (!%p114_p2), %vm546_vm5, %v545_v15  ;;  %v156_v19 = vrot.slane (!%p114_p2), %v147_v0, %v155_v18  ;;  %v248_v27 = vrot.slane (!%p114_p2), %v149_v4, %v247_v26  ;;  %v348_v35 = vrot.slane (!%p114_p2), %v150_v3, %v347_v34 }
   0xd   : > { %s639_s13 = smov (!%p136_p3, %s500_s13), 7  ;;  %550 = vmatpush3.bf16.msk.msra.mxu1 %vm546_vm5, %v545_v15 }
   0xe   : > { %s501_s14 = sshll.u32 %s639_s13, 3 }
   0xf   : > { %s139_s17 = scalar_lea.vmem %s635_s0, %s501_s14  ;;  %s145_s26 = scalar_lea.vmem %s637_s2, %s501_s14 }
  0x10   : > { %v151_v1 = vld [vmem:[%s139_s17] sm:$0xff]  ;;  %v152_v2 = vld [vmem:[%s139_s17 + $0x8] sm:$0xff] }
  0x11   : > { %528 = vmatprep.mubr.msk.f32.mxu0 %vm157_vm1, %v151_v1 }
  0x12   : > { %529 = vmatmul.mubr.msk.f32.vlgmr.msra.gmra.mrb[0].mxu0 %vm157_vm1, %v152_v2 }
  0x13   : > { %556 = vmatpush3.bf16.msk.msra.mxu0 %vm546_vm5, %v551_v12 }
  0xe5   : > { %v530_v20 = vpop.f32.mrb[0].mxu0 }
  0xe6   : > { %v240_v21 = vadd.f32 %v530_v20, %v156_v19  ;;  %v234_v22 = vpop.f32.mrb[1].mxu0 }
  0xe7   : > { %v235_v23 = vadd.f32 %v234_v22, %v156_v19 }
  0xe8   : > { %v244_v25 = vmax.f32 %v240_v21, 0.0 }
  0xe9   : > { %v243_v24 = vmax.f32 %v235_v23, 0.0 }
  0xeb   : > { %535 = vmatprep.mubr.msk.f32.mxu1 %vm258_vm6, %v243_v24 }
  0xec   : > { %536 = vmatmul.mubr.msk.f32.vlgmr.msra.gmra.mrb[0].mxu1 %vm258_vm6, %v244_v25 }
 0x1bf   : > { %v537_v28 = vpop.f32.mrb[0].mxu1 }
 0x1c0   : > { %v340_v29 = vadd.f32 %v537_v28, %v248_v27  ;;  %v334_v30 = vpop.f32.mrb[1].mxu1 }
 0x1c1   : > { %v335_v31 = vadd.f32 %v334_v30, %v248_v27 }
 0x1c2   : > { %v344_v33 = vmax.f32 %v340_v29, 0.0 }
 0x1c3   : > { %v343_v32 = vmax.f32 %v335_v31, 0.0 }
 0x1c5   : > { %542 = vmatprep.mubr.msk.f32.mxu0 %vm258_vm6, %v343_v32 }
 0x1c6   : > { %543 = vmatmul.mubr.msk.f32.vlgmr.msra.gmra.mrb[2].mxu0 %vm258_vm6, %v344_v33 }
 0x299   : > { %v544_v36 = vpop.f32.mrb[2].mxu0 }
 0x29a   : > { %v428_v37 = vpop.f32.mrb[3].mxu0  ;;  %v434_v39 = vadd.f32 %v544_v36, %v348_v35 }
 0x29b   : > { %v429_v38 = vadd.f32 %v428_v37, %v348_v35 }
 0x29c   : > { %438 = vst.msk [vmem:[%s145_s26 + $0x8] sm:$0xff] %vm258_vm6, %v434_v39 }
 0x29d   : > { %437 = vst.msk [vmem:[%s145_s26] sm:$0xff] %vm258_vm6, %v429_v38 }
 0x29e PF: > { %s12_s9 = sadd.s32 1, %s572_s9  }
 0x29f   : > { %p9_p4 = scmp.ge.s32.totalorder %s12_s9, 6  }
 0x2a1   :  { %11 = sbr.rel (!%p9_p4) target bundleno = 1 (0x1), region = 58 }

</bundles_post_ra>
